<compile_context>
chip_gen: v7x
topology: tpu7x:2x2x1
jax: 0.10.0
libtpu: 0.0.40
codegen_flags: <defaults>
</compile_context>

<pallas_src>
import functools

import jax
import jax.numpy as jnp
from jax import lax
from jax.experimental import pallas as pl
from jax.experimental.pallas import tpu as pltpu


def _out_proj_kernel(x_ref, w_ref, b_ref, o_ref, *, flatten_m, dense_store):
    # x_ref: (bsz, H, tt, Dh)  all heads of this row tile
    # w_ref: (E, E)            nn.Linear weight (out, in), VMEM-resident
    # b_ref: (1, E)            bias
    # o_ref: (tt, bsz, E)      output tile in the module's (tgt, bsz, E) layout
    bsz, num_heads, tt, head_dim = x_ref.shape
    embed_dim = w_ref.shape[1]

    # Head concat along the feature (lane) axis -> (bsz, tt, E).  This is the
    # only data reordering needed on the input side; rows stay in (b, t) order.
    if num_heads > 1:
        x_cat = jnp.concatenate(
            [x_ref[:, h] for h in range(num_heads)], axis=-1)
    else:
        x_cat = x_ref[:, 0]

    # y = x_cat @ W.T with full K = embed_dim contraction depth per MXU pass.
    if flatten_m:
        # Free reshape (tt % 8 == 0): one 2-D matmul with M = bsz * tt.
        lhs = x_cat.reshape(bsz * tt, embed_dim)
        y = lax.dot_general(lhs, w_ref[...], (((1,), (1,)), ((), ())),
                            preferred_element_type=jnp.float32)
        y = y.reshape(bsz, tt, embed_dim)
    else:
        # Fallback for row tiles that are not sublane aligned.
        y = lax.dot_general(x_cat, w_ref[...], (((2,), (1,)), ((), ())),
                            preferred_element_type=jnp.float32)

    y = y + b_ref[...].reshape(1, 1, embed_dim)       # bias in f32
    y = y.astype(o_ref.dtype)                          # downcast BEFORE relayout

    if dense_store:
        # bsz % 8 == 0: sublane-dense store of the whole (tt, bsz, E) tile.
        o_ref[...] = jnp.transpose(y, (1, 0, 2))
    else:
        # Small / unaligned bsz: per-batch column stores, no transpose needed.
        for b in range(bsz):
            o_ref[:, b, :] = y[b]


def _pick_row_tile(tgt_len, bsz, embed_dim, x_bytes, o_bytes, w_bytes,
                   budget_bytes):
    """Largest row tile whose per-step VMEM working set fits the budget."""
    per_row = bsz * embed_dim
    w_resident = 2 * embed_dim * embed_dim * w_bytes + 2 * embed_dim * 4

    def working_set(tt):
        io = per_row * tt * 2 * (x_bytes + o_bytes)        # double-buffered x / out blocks
        tmp = per_row * tt * (x_bytes + 4 + 2 * o_bytes)   # concat lhs + f32 result + epilogue copies
        return w_resident + io + tmp

    cands = [d for d in range(8, tgt_len + 1, 8) if tgt_len % d == 0]
    if not cands:
        return tgt_len                                  # full-extent block (always legal)
    fits = [tt for tt in cands if working_set(tt) <= budget_bytes]
    if not fits:
        return cands[0]                                 # smallest aligned divisor, best effort
    multi = [tt for tt in fits if tgt_len // tt >= 2]   # >= 2 tiles so both v7x TCs get work
    return max(multi) if multi else max(fits)


def multihead_attention_out_projection(attn_output, weight, bias, *, num_heads):
    """attn_output: (bsz*num_heads, tgt_len, head_dim)
       weight: (embed_dim, embed_dim)  nn.Linear convention (y = x @ W.T + b)
       bias:   (embed_dim,)
       returns (tgt_len, bsz, embed_dim)
    """
    batch_heads, tgt_len, head_dim = attn_output.shape
    assert batch_heads % num_heads == 0, "batch_heads must be divisible by num_heads"
    bsz = batch_heads // num_heads
    embed_dim = num_heads * head_dim
    assert weight.shape == (embed_dim, embed_dim)
    assert bias.shape == (embed_dim,)

    out_dtype = jnp.result_type(attn_output.dtype, weight.dtype)

    # Free view, no data movement: (bsz*H, T, Dh) -> (bsz, H, T, Dh).
    x4 = attn_output.reshape(bsz, num_heads, tgt_len, head_dim)
    b2 = bias.reshape(1, embed_dim)

    x_bytes = jnp.dtype(attn_output.dtype).itemsize
    w_bytes = jnp.dtype(weight.dtype).itemsize
    o_bytes = jnp.dtype(out_dtype).itemsize

    # ~36 MiB working-set target + 48 MiB scoped limit fits every generation
    # (v7x has only 64 MiB physical VMEM per TensorCore).
    vmem_budget = 36 * 1024 * 1024
    tt = _pick_row_tile(tgt_len, bsz, embed_dim, x_bytes, o_bytes, w_bytes,
                        vmem_budget)
    grid = (tgt_len // tt,)

    flatten_m = (tt % 8 == 0)
    dense_store = (bsz % 8 == 0)

    kernel = functools.partial(_out_proj_kernel,
                               flatten_m=flatten_m, dense_store=dense_store)

    flops = 2 * tgt_len * bsz * embed_dim * embed_dim
    bytes_accessed = (bsz * tgt_len * embed_dim * x_bytes
                      + embed_dim * embed_dim * w_bytes
                      + embed_dim * 4
                      + tgt_len * bsz * embed_dim * o_bytes)

    return pl.pallas_call(
        kernel,
        out_shape=jax.ShapeDtypeStruct((tgt_len, bsz, embed_dim), out_dtype),
        grid=grid,
        in_specs=[
            # All heads of one row tile of the activations.
            pl.BlockSpec((bsz, num_heads, tt, head_dim), lambda ti: (0, 0, ti, 0)),
            # Full weight, constant block index -> fetched once, stays resident.
            pl.BlockSpec((embed_dim, embed_dim), lambda ti: (0, 0)),
            pl.BlockSpec((1, embed_dim), lambda ti: (0, 0)),
        ],
        out_specs=pl.BlockSpec((tt, bsz, embed_dim), lambda ti: (ti, 0, 0)),
        compiler_params=pltpu.CompilerParams(
            dimension_semantics=("parallel",),
            vmem_limit_bytes=48 * 1024 * 1024),
        cost_estimate=pl.CostEstimate(flops=int(flops), transcendentals=0,
                                      bytes_accessed=int(bytes_accessed)),
    )(x4, weight, b2)


if __name__ == "__main__":
    key = jax.random.PRNGKey(0)
    embed_dim, num_heads = 32, 2
    head_dim = embed_dim // num_heads
    bsz, tgt_len = 2, 8

    k1, k2, k3 = jax.random.split(key, 3)
    attn_output = jax.random.normal(
        k1, (bsz * num_heads, tgt_len, head_dim), dtype=jnp.float32)
    weight = 0.02 * jax.random.normal(k2, (embed_dim, embed_dim), dtype=jnp.float32)
    bias = 0.02 * jax.random.normal(k3, (embed_dim,), dtype=jnp.float32)

    out = multihead_attention_out_projection(
        attn_output, weight, bias, num_heads=num_heads)
    out = jax.block_until_ready(out)

    # Pure-JAX reference matching the PyTorch module exactly.
    ref = jnp.transpose(attn_output, (1, 0, 2)).reshape(tgt_len, bsz, embed_dim)
    ref = ref @ weight.T + bias

    assert out.shape == (tgt_len, bsz, embed_dim)
    assert bool(jnp.all(jnp.isfinite(out)))
    assert bool(jnp.allclose(out, ref, rtol=1e-4, atol=1e-4)), \
        float(jnp.max(jnp.abs(out - ref)))
    print("KERNEL_OK")
</pallas_src>

<mosaic_0001>
module attributes {stable_mosaic.version = 11 : i64} {
  func.func @_out_proj_kernel(%arg0: i32, %arg1: memref<2x2x8x16xf32, #tpu.memory_space<vmem>>, %arg2: memref<32x32xf32, #tpu.memory_space<vmem>>, %arg3: memref<1x32xf32, #tpu.memory_space<vmem>>, %arg4: memref<8x2x32xf32, #tpu.memory_space<vmem>>) attributes {dimension_semantics = [#tpu.dimension_semantics<parallel>], iteration_bounds = array<i64: 1>, scalar_prefetch = 0 : i64, scratch_operands = 0 : i64, tpu.core_type = #tpu.core_type<tc>, window_params = [{transform_indices = @transform_0, window_bounds = array<i64: 2, 2, 8, 16>}, {pipeline_mode = #tpu.pipeline_mode<synchronous>, transform_indices = @transform_1, window_bounds = array<i64: 32, 32>}, {pipeline_mode = #tpu.pipeline_mode<synchronous>, transform_indices = @transform_2, window_bounds = array<i64: 1, 32>}, {transform_indices = @transform_3, window_bounds = array<i64: 8, 2, 32>}]} {
    %c0 = arith.constant 0 : index
    %c0_0 = arith.constant 0 : index
    %c0_1 = arith.constant 0 : index
    %c0_2 = arith.constant 0 : index
    %0 = vector.load %arg1[%c0, %c0_0, %c0_1, %c0_2] : memref<2x2x8x16xf32, #tpu.memory_space<vmem>>, vector<2x1x8x16xf32>
    %1 = vector.shape_cast %0 : vector<2x1x8x16xf32> to vector<2x8x16xf32>
    %c0_3 = arith.constant 0 : index
    %c1 = arith.constant 1 : index
    %c0_4 = arith.constant 0 : index
    %c0_5 = arith.constant 0 : index
    %2 = vector.load %arg1[%c0_3, %c1, %c0_4, %c0_5] : memref<2x2x8x16xf32, #tpu.memory_space<vmem>>, vector<2x1x8x16xf32>
    %3 = vector.shape_cast %2 : vector<2x1x8x16xf32> to vector<2x8x16xf32>
    %4 = tpu.concatenate %1, %3 in 2 : vector<2x8x16xf32>, vector<2x8x16xf32> -> vector<2x8x32xf32>
    %5 = vector.shape_cast %4 : vector<2x8x32xf32> to vector<16x32xf32>
    %c0_6 = arith.constant 0 : index
    %c0_7 = arith.constant 0 : index
    %6 = vector.load %arg2[%c0_6, %c0_7] : memref<32x32xf32, #tpu.memory_space<vmem>>, vector<32x32xf32>
    %cst = arith.constant dense<0.000000e+00> : vector<16x32xf32>
    %7 = tpu.matmul %5, %6, %cst {dimension_numbers = #tpu.dot_dimension_numbers<[1], [1], [0], [0], [0, 0, 1, 0], [], []>} : vector<16x32xf32>, vector<32x32xf32>, vector<16x32xf32> -> vector<16x32xf32>
    %8 = vector.shape_cast %7 : vector<16x32xf32> to vector<2x8x32xf32>
    %c0_8 = arith.constant 0 : index
    %c0_9 = arith.constant 0 : index
    %9 = vector.load %arg3[%c0_8, %c0_9] : memref<1x32xf32, #tpu.memory_space<vmem>>, vector<1x32xf32>
    %10 = vector.shape_cast %9 : vector<1x32xf32> to vector<1x1x32xf32>
    %11 = vector.broadcast %10 : vector<1x1x32xf32> to vector<2x8x32xf32>
    %12 = arith.addf %8, %11 : vector<2x8x32xf32>
    %13 = vector.extract_strided_slice %12 {offsets = [0, 0, 0], sizes = [1, 8, 32], strides = [1, 1, 1]} : vector<2x8x32xf32> to vector<1x8x32xf32>
    %14 = vector.shape_cast %13 : vector<1x8x32xf32> to vector<8x32xf32>
    %c0_10 = arith.constant 0 : index
    %c0_11 = arith.constant 0 : index
    %c0_12 = arith.constant 0 : index
    %15 = vector.load %arg4[%c0_10, %c0_11, %c0_12] : memref<8x2x32xf32, #tpu.memory_space<vmem>>, vector<8x1x32xf32>
    %16 = vector.shape_cast %15 : vector<8x1x32xf32> to vector<8x32xf32>
    %17 = vector.shape_cast %14 : vector<8x32xf32> to vector<8x1x32xf32>
    tpu.vector_store %arg4[%c0_10, %c0_11, %c0_12], %17 {strides = array<i32>} : memref<8x2x32xf32, #tpu.memory_space<vmem>>, vector<8x1x32xf32>,
    %18 = vector.extract_strided_slice %12 {offsets = [1, 0, 0], sizes = [1, 8, 32], strides = [1, 1, 1]} : vector<2x8x32xf32> to vector<1x8x32xf32>
    %19 = vector.shape_cast %18 : vector<1x8x32xf32> to vector<8x32xf32>
    %c0_13 = arith.constant 0 : index
    %c1_14 = arith.constant 1 : index
    %c0_15 = arith.constant 0 : index
    %20 = vector.load %arg4[%c0_13, %c1_14, %c0_15] : memref<8x2x32xf32, #tpu.memory_space<vmem>>, vector<8x1x32xf32>
    %21 = vector.shape_cast %20 : vector<8x1x32xf32> to vector<8x32xf32>
    %22 = vector.shape_cast %19 : vector<8x32xf32> to vector<8x1x32xf32>
    tpu.vector_store %arg4[%c0_13, %c1_14, %c0_15], %22 {strides = array<i32>} : memref<8x2x32xf32, #tpu.memory_space<vmem>>, vector<8x1x32xf32>,
    return
  }
  func.func @transform_0(%arg0: i32) -> (i32, i32, i32, i32) {
    %c0_i32 = arith.constant 0 : i32
    %c0_i32_0 = arith.constant 0 : i32
    %c0_i32_1 = arith.constant 0 : i32
    %c0_i32_2 = arith.constant 0 : i32
    return %c0_i32, %c0_i32_0, %arg0, %c0_i32_1 : i32, i32, i32, i32
  }
  func.func @transform_1(%arg0: i32) -> (i32, i32) {
    %c0_i32 = arith.constant 0 : i32
    %c0_i32_0 = arith.constant 0 : i32
    %c0_i32_1 = arith.constant 0 : i32
    return %c0_i32, %c0_i32_0 : i32, i32
  }
  func.func @transform_2(%arg0: i32) -> (i32, i32) {
    %c0_i32 = arith.constant 0 : i32
    %c0_i32_0 = arith.constant 0 : i32
    %c0_i32_1 = arith.constant 0 : i32
    return %c0_i32, %c0_i32_0 : i32, i32
  }
  func.func @transform_3(%arg0: i32) -> (i32, i32, i32) {
    %c0_i32 = arith.constant 0 : i32
    %c0_i32_0 = arith.constant 0 : i32
    %c0_i32_1 = arith.constant 0 : i32
    return %arg0, %c0_i32, %c0_i32_0 : i32, i32, i32
  }
}

</mosaic_0001>

<bundles_post_ra>
// kernel: tpu_custom_call.1
= control target key start
LH: loop header
LB: loop body
LE: loop exit
PB: predicated region body
PF: predicated region fallthrough
CT: control target
= control target key end

     0   :  { %8 = vsyncpa [#allocation3], 0  ;;  %s522_s0 = inlined_call_operand.hbm [shape: f32[2,2,8,16], index: 0, kind: input, shape index: {}]   ;;  %s523_s1 = inlined_call_operand.hbm [shape: f32[32,32], index: 1, kind: input, shape index: {}]   ;;  %s524_s2 = inlined_call_operand.vmem [shape: f32[1,32], index: 2, kind: input, shape index: {}]   ;;  %s525_s3 = inlined_call_operand.hbm [shape: f32[8,2,32], index: 3, kind: output, shape index: {}]  }
   0x1   :  { %9 = vsyncpa [#allocation6], 0 }
   0x2   :  { %10 = vsyncpa [#allocation4], 0  ;;  %s434_s12 = smov [#allocation2]   ;;  %s362_s16 = scalar_lea.hbm %s522_s0, 512 }
   0x3   :  { %s16_s13 = sshll.u32 %s434_s12, 4  ;;  %p363_p0 = scmp.ne.s32.totalorder %s522_s0, %s362_s16  ;;  %s17_s13 = int_to_ptr.vmem [resolvable:$true] %s16_s13 }
   0x4   :  { %p366_p1 = scmp.lt.u32.totalorder %s362_s16, %s522_s0 }
   0x6   :  { %p368_p2 = pnand %p366_p1, %p363_p0 }
   0x8   :  { %371 = shalt.err (!%p368_p2)
}
   0x9   :  { %s372_s21 = scalar_lea.vmem %s17_s13, 512  ;;  %p377_p4 = scmp.lt.s32.totalorder %s17_s13, %s17_s13 }
   0xa   :  { %p373_p3 = scmp.ne.s32.totalorder %s17_s13, %s372_s21  ;;  %p378_p5 = scmp.lt.s32.totalorder %s372_s21, %s372_s21 }
   0xc   :  { %p379_p6 = por %p378_p5, %p377_p4 }
   0xe   :  { %p380_p7 = pnand %p379_p6, %p373_p3 }
  0x10   :  { %383 = shalt.err (!%p380_p7)
}
  0x11   :  { %s435_s22 = smov 128   ;;  %s436_s23 = smov 8  }
  0x12   :  { %22 = dma.hbm_to_vmem [thread:$0]  %s522_s0, 512, %s17_s13, [#allocation3], %s435_s22, %s435_s22, %s436_s23  }
  0x13   :  { %s437_s26 = smov [#allocation5]   ;;  %s384_s30 = scalar_lea.hbm %s523_s1, 512 }
  0x14   :  { %s28_s27 = sshll.u32 %s437_s26, 4  ;;  %p385_p8 = scmp.ne.s32.totalorder %s523_s1, %s384_s30  ;;  %s29_s27 = int_to_ptr.vmem [resolvable:$true] %s28_s27 }
  0x15   :  { %p388_p9 = scmp.lt.u32.totalorder %s384_s30, %s523_s1 }
  0x17   :  { %p390_p10 = pnand %p388_p9, %p385_p8 }
  0x19   :  { %393 = shalt.err (!%p390_p10)
}
  0x1a   :  { %s394_s8 = scalar_lea.vmem %s29_s27, 512  ;;  %p399_p12 = scmp.lt.s32.totalorder %s29_s27, %s29_s27 }
  0x1b   :  { %p395_p11 = scmp.ne.s32.totalorder %s29_s27, %s394_s8  ;;  %p400_p13 = scmp.lt.s32.totalorder %s394_s8, %s394_s8 }
  0x1d   :  { %p401_p0 = por %p400_p13, %p399_p12 }
  0x1f   :  { %p402_p1 = pnand %p401_p0, %p395_p11 }
  0x21   :  { %405 = shalt.err (!%p402_p1)
}
  0x22   :  { %34 = dma.hbm_to_vmem [thread:$0]  %s523_s1, 512, %s29_s27, [#allocation6], %s435_s22, %s435_s22, %s436_s23  }
  0x23   :  { %428 = dma.done.wait [#allocation3], 512  }
  0x24   :  { %429 = vsyncadd [#allocation3], 4294966784 }
  0x25   :  { %430 = dma.done.wait [#allocation6], 512  }
  0x26   :  { %431 = vsyncadd [#allocation6], 4294966784  ;;  %vm63_vm0 = vcmask 261120   ;;  %v46_v0 = vld [vmem:[#allocation2 + $0x8] sm:$0xff]  ;;  %v59_v1 = vld [vmem:[#allocation5] sm:$0xff]  ;;  %s438_s10 = smov 16   ;;  %v171_v16 = vlaneseq }
  0x27   :  { %vm342_vm1 = vmpackc.low %vm63_vm0, %vm63_vm0  ;;  %50 = vrot.lane.b32.xlu0 %v46_v0, %s438_s10  ;;  %v60_v2 = vld [vmem:[#allocation5 + $0x8] sm:$0xff]  ;;  %v61_v3 = vld [vmem:[#allocation5 + $0x10] sm:$0xff]  ;;  %vm56_vm2 = vcmask 130048   ;;  %v439_v14 = vmov 1966171168   ;;  %vm224_vm3 = vcmask 253952  }
  0x28   :  { %v62_v4 = vld [vmem:[#allocation5 + $0x18] sm:$0xff]  ;;  %v341_v6 = vpack.c.bf16 %v60_v2, %v59_v1  ;;  %v43_v8 = vld [vmem:[#allocation2] sm:$0xff]  ;;  %v44_v11 = vld [vmem:[#allocation2 + $0x10] sm:$0xff]  ;;  %v169_v15 = vunpack.c.l.s4 %v439_v14  ;;  %v172_v18 = vshrl.u32 %v171_v16, 7 }
  0x29   :  { %v47_v5 = vld [vmem:[#allocation2 + $0x18] sm:$0xff]  ;;  %v347_v7 = vpack.c.bf16 %v62_v4, %v61_v3  ;;  %v323_v19 = vld [vmem:[%s524_s2] ss:$0 sm:$0xff]  ;;  %s440_s2 = smov [#allocation7]  }
  0x2a   :  { %343 = vmatprep.subr.msk.bf16.mxu0 %vm342_vm1, %v341_v6  ;;  %v170_v17 = vunpack.c.0.s8 %v169_v15  ;;  %s304_s12 = sshll.u32 %s440_s2, 4  ;;  %s305_s12 = int_to_ptr.vmem [resolvable:$true] %s304_s12 }
  0x2b   :  { %52 = vrot.lane.b32.xlu0 %v47_v5, %s438_s10  ;;  %346 = vmatpush3.bf16.xpose.msk.msra.mxu0 %vm342_vm1, %v341_v6  ;;  %s406_s13 = scalar_lea.vmem %s305_s12, 256  ;;  %p411_p3 = scmp.lt.s32.totalorder %s305_s12, %s305_s12 }
  0x2c   :  { %349 = vmatprep.subr.msk.bf16.mxu0 %vm342_vm1, %v347_v7  ;;  %v173_v20 = vsub.s32 %v170_v17, %v172_v18  ;;  %p407_p2 = scmp.ne.s32.totalorder %s305_s12, %s406_s13  ;;  %p412_p4 = scmp.lt.s32.totalorder %s406_s13, %s406_s13 }
  0x2e   :  { %p413_p5 = por %p412_p4, %p411_p3 }
  0x30   :  { %p414_p6 = pnand %p413_p5, %p407_p2 }
  0x33   :  { %352 = vmatpush3.bf16.xpose.msk.msra.mxu0 %vm342_vm1, %v347_v7 }
  0x99   :  { %v51_v9 = vpop.permute.xlu0 %50 }
  0x9a   :  { %v57_v10 = vsel %vm56_vm2, %v43_v8, %v51_v9 }
  0x9b   :  { %338 = vmatprep.mubr.msk.f32.mxu0 %vm63_vm0, %v57_v10 }
  0x9d   :  { %v53_v12 = vpop.permute.xlu0 %52 }
  0x9e   :  { %v58_v13 = vsel %vm56_vm2, %v44_v11, %v53_v12 }
  0x9f   :  { %339 = vmatmul.mubr.msk.f32.vlgmr.msra.gmra.mrb[0].mxu0 %vm63_vm0, %v58_v13 }
 0x172   :  { %v340_v21 = vpop.f32.mrb[0].mxu0 }
 0x173   :  { %v165_v22 = vadd.f32 %v340_v21, %v323_v19  ;;  %v148_v23 = vpop.f32.mrb[1].mxu0 }
 0x174   :  { %v164_v24 = vadd.f32 %v323_v19, %v148_v23 }
 0x175   :  { %v234_v25 = vcombine.high %v165_v22, %v165_v22  ;;  %v241_v26 = vrot.slane %v165_v22, %v173_v20 }
 0x176   :  { %v167_v27 = vcombine.high %v164_v24, %v164_v24  ;;  %v174_v28 = vrot.slane %v164_v24, %v173_v20 }
 0x177   :  { %v248_v29 = vrot.slane %v234_v25, %v173_v20  ;;  %v249_v30 = vcombine.high %v241_v26, %v241_v26  ;;  %v257_v31 = vrot.slane %v241_v26, %v173_v20 }
 0x178   :  { %v181_v32 = vrot.slane %v167_v27, %v173_v20  ;;  %v182_v33 = vcombine.high %v174_v28, %v174_v28  ;;  %v190_v34 = vrot.slane %v174_v28, %v173_v20 }
 0x179   :  { %v250_v35 = vcombine.high %v248_v29, %v248_v29  ;;  %v264_v36 = vrot.slane %v248_v29, %v173_v20  ;;  %v271_v37 = vrot.slane %v249_v30, %v173_v20  ;;  %v279_v38 = vcombine.high %v257_v31, %v257_v31  ;;  %291 = vst.msk [vmem:[#allocation7 + $0x1] sm:$0x1] %vm224_vm3, %v257_v31 }
 0x17a   :  { %v183_v39 = vcombine.high %v181_v32, %v181_v32  ;;  %v197_v40 = vrot.slane %v181_v32, %v173_v20  ;;  %v204_v41 = vrot.slane %v182_v33, %v173_v20  ;;  %v212_v42 = vcombine.high %v190_v34, %v190_v34  ;;  %225 = vst.msk [vmem:[#allocation7] sm:$0x1] %vm224_vm3, %v190_v34 }
 0x17b   :  { %v278_v43 = vrot.slane %v250_v35, %v173_v20  ;;  %v280_v44 = vcombine.high %v264_v36, %v264_v36  ;;  %v281_v45 = vcombine.high %v271_v37, %v271_v37  ;;  %292 = vst.msk [vmem:[#allocation7 + $0x3] sm:$0x1] %vm224_vm3, %v271_v37  ;;  %293 = vst.msk [vmem:[#allocation7 + $0x5] sm:$0x1] %vm224_vm3, %v279_v38 }
 0x17c   :  { %295 = vst.msk [vmem:[#allocation7 + $0x9] sm:$0x1] %vm224_vm3, %v264_v36  ;;  %v211_v46 = vrot.slane %v183_v39, %v173_v20  ;;  %v213_v47 = vcombine.high %v197_v40, %v197_v40  ;;  %v214_v48 = vcombine.high %v204_v41, %v204_v41  ;;  %226 = vst.msk [vmem:[#allocation7 + $0x2] sm:$0x1] %vm224_vm3, %v204_v41 }
 0x17d   :  { %227 = vst.msk [vmem:[#allocation7 + $0x4] sm:$0x1] %vm224_vm3, %v212_v42  ;;  %229 = vst.msk [vmem:[#allocation7 + $0x8] sm:$0x1] %vm224_vm3, %v197_v40  ;;  %v282_v49 = vcombine.high %v278_v43, %v278_v43 }
 0x17e   :  { %294 = vst.msk [vmem:[#allocation7 + $0x7] sm:$0x1] %vm224_vm3, %v281_v45  ;;  %296 = vst.msk [vmem:[#allocation7 + $0xb] sm:$0x1] %vm224_vm3, %v278_v43  ;;  %v215_v50 = vcombine.high %v211_v46, %v211_v46 }
 0x17f   :  { %297 = vst.msk [vmem:[#allocation7 + $0xd] sm:$0x1] %vm224_vm3, %v280_v44  ;;  %228 = vst.msk [vmem:[#allocation7 + $0x6] sm:$0x1] %vm224_vm3, %v214_v48 }
 0x180   :  { %230 = vst.msk [vmem:[#allocation7 + $0xa] sm:$0x1] %vm224_vm3, %v211_v46  ;;  %231 = vst.msk [vmem:[#allocation7 + $0xc] sm:$0x1] %vm224_vm3, %v213_v47 }
 0x181   :  { %298 = vst.msk [vmem:[#allocation7 + $0xf] sm:$0x1] %vm224_vm3, %v282_v49  ;;  %232 = vst.msk [vmem:[#allocation7 + $0xe] sm:$0x1] %vm224_vm3, %v215_v50 }
 0x182   :  { %417 = shalt.err (!%p414_p6)
}
 0x183   :  { %s418_s16 = scalar_lea.hbm %s525_s3, 256 }
 0x184   :  { %p419_p7 = scmp.ne.s32.totalorder %s525_s3, %s418_s16  ;;  %p422_p8 = scmp.lt.u32.totalorder %s418_s16, %s525_s3 }
 0x186   :  { %p424_p9 = pnand %p422_p8, %p419_p7 }
 0x188   :  { %427 = shalt.err (!%p424_p9)
}
 0x189   :  { %s441_s21 = smov 32   ;;  %s442_s22 = smov 2  }
 0x18a   :  { %310 = dma.vmem_to_hbm [thread:$0]  %s305_s12, 256, %s525_s3, [#allocation4], %s441_s21, %s441_s21, %s442_s22  }
 0x18b   :  { %432 = dma.done.wait [#allocation4], 256  }
 0x18c   :  { %433 = vsyncadd [#allocation4], 4294967040 }
 0x18d   :  { %314 = vsyncpa [#allocation3], 1 }
 0x18e   :  { %315 = vsyncpa [#allocation6], 1 }
 0x18f   :  { %316 = vsyncpa [#allocation4], 1 }

</bundles_post_ra>
